<compile_context>
chip_gen: v7x
topology: tpu7x:2x2x1
jax: 0.10.0
libtpu: 0.0.40
codegen_flags: <defaults>
</compile_context>

<pallas_src>
import functools
import math

import jax
import jax.numpy as jnp
from jax.experimental import pallas as pl
from jax.experimental.pallas import tpu as pltpu


def _build_pos_embedding(emb_size: int, maxlen: int) -> jnp.ndarray:
    """Deterministic sin/cos table, identical to the PyTorch __init__."""
    assert emb_size % 2 == 0, "emb_size must be even (same as the PyTorch module)"
    den = jnp.exp(-jnp.arange(0, emb_size, 2, dtype=jnp.float32)
                  * math.log(10000.0) / emb_size)                # (E/2,)
    pos = jnp.arange(0, maxlen, dtype=jnp.float32)[:, None]      # (maxlen, 1)
    angles = pos * den[None, :]                                  # (maxlen, E/2)
    pe = jnp.zeros((maxlen, emb_size), dtype=jnp.float32)
    pe = pe.at[:, 0::2].set(jnp.sin(angles))
    pe = pe.at[:, 1::2].set(jnp.cos(angles))
    return pe                                                    # (maxlen, E)


# --------------------------------------------------------------------------
# Kernels
# --------------------------------------------------------------------------
def _pe_kernel_3d(x_ref, pos_ref, o_ref):
    # x_ref/o_ref: (tq, B, E); pos_ref: (tq, 1, E).
    # Layouts match (B on sublanes, E on lanes for both), so the batch
    # broadcast is a stride-0 sublane read — no relayout work.
    o_ref[...] = (x_ref[...] + pos_ref[...]).astype(o_ref.dtype)


def _pe_kernel_2d(x_ref, pos_ref, o_ref, *, batch: int):
    # Lane-dense path for small B / narrow E.
    # x_ref/o_ref: (tq, B*E); pos_ref: (tq, E).  Replicate the pos row across
    # the B lane-groups (cross-lane copy -> XLU slot, idle in this kernel).
    pos = pos_ref[...]
    if batch > 1:
        pos = jnp.tile(pos, (1, batch))
    o_ref[...] = (x_ref[...] + pos).astype(o_ref.dtype)


# --------------------------------------------------------------------------
# Tiling heuristics
# --------------------------------------------------------------------------
def _device_block_budget():
    """(target_block_bytes, vmem_limit_bytes) tuned per TPU generation."""
    try:
        kind = jax.devices()[0].device_kind.lower()
    except Exception:
        return 1 << 20, None
    if "v7" in kind:
        # Faster HBM: bigger blocks amortize the ~0.35us per-step overhead.
        # Live VMEM ~ 2 x (x + out + pos) ~= 16-20 MiB; raise the scoped limit.
        return 4 << 20, 32 << 20
    if "v6" in kind:
        return 2 << 20, None         # fits the 32 MiB scoped-VMEM default
    return 1 << 20, None             # v5e (16 MiB scoped default) & unknown


def _choose_seq_tile(S: int, bytes_per_seq_row: int, target_block_bytes: int) -> int:
    """Sequence-tile size: ~target_block_bytes of padded VMEM per block,
    8-aligned sublane-dense tq, and a few grid steps when data is large."""
    tq = max(1, target_block_bytes // max(1, bytes_per_seq_row))
    tq = min(tq, S)
    if S >= 8:
        tq = max(8, (tq // 8) * 8)          # dense sublane DMA
    total_bytes = S * bytes_per_seq_row
    if total_bytes > (2 << 20):
        # Enough data that pipelining / both v7x TensorCores matter.
        min_steps = 4 if total_bytes > (16 << 20) else 2
        cap = -(-S // min_steps)
        if cap >= 8:
            cap = (cap // 8) * 8
        tq = min(tq, max(1, cap))
    return int(max(1, tq))


# --------------------------------------------------------------------------
# Wrapper
# --------------------------------------------------------------------------
def positional_encoding(token_embedding: jnp.ndarray,
                        pos_embedding: jnp.ndarray,
                        *,
                        seq_tile: int | None = None) -> jnp.ndarray:
    """token_embedding: (S, B, E); pos_embedding: (maxlen, E) fp32 table.

    NOTE: the add runs in the activation dtype (bf16 activations -> bf16 add)
    to halve HBM traffic; PyTorch with a fp32 registered buffer would promote
    to fp32.  Intentional; documented per review.
    """
    S, B, E = token_embedding.shape
    dtype = token_embedding.dtype
    itemsize = jnp.dtype(dtype).itemsize

    # Small (S, E) table slice, cast once to the activation dtype.
    pos_slice = pos_embedding[:S].astype(dtype)

    target_block_bytes, vmem_limit = _device_block_budget()

    # Lane/sublane-densification gate: realistic transformer dims
    # (E % 128 == 0, B >= 8) use the 3D path; small dims use the flattened one.
    use_2d = (B < 8) or (E % 128 != 0)

    if use_2d:
        padded_w = -(-(B * E) // 128) * 128
        bytes_per_row = padded_w * itemsize
        tq = seq_tile if seq_tile is not None else _choose_seq_tile(
            S, bytes_per_row, target_block_bytes)
        grid = (pl.cdiv(S, tq),)
        x_in = token_embedding.reshape(S, B * E)     # trailing-dim collapse: free
        kernel = functools.partial(_pe_kernel_2d, batch=B)
        in_specs = [
            pl.BlockSpec((tq, B * E), lambda i: (i, 0)),
            pl.BlockSpec((tq, E), lambda i: (i, 0)),
        ]
        out_specs = pl.BlockSpec((tq, B * E), lambda i: (i, 0))
        out_shape = jax.ShapeDtypeStruct((S, B * E), dtype)
        args = (x_in, pos_slice)
    else:
        padded_b = -(-B // 8) * 8
        padded_e = -(-E // 128) * 128
        bytes_per_row = padded_b * padded_e * itemsize
        tq = seq_tile if seq_tile is not None else _choose_seq_tile(
            S, bytes_per_row, target_block_bytes)
        grid = (pl.cdiv(S, tq),)
        kernel = _pe_kernel_3d
        in_specs = [
            pl.BlockSpec((tq, B, E), lambda i: (i, 0, 0)),
            pl.BlockSpec((tq, 1, E), lambda i: (i, 0, 0)),
        ]
        out_specs = pl.BlockSpec((tq, B, E), lambda i: (i, 0, 0))
        out_shape = jax.ShapeDtypeStruct((S, B, E), dtype)
        args = (token_embedding, pos_slice[:, None, :])

    out = pl.pallas_call(
        kernel,
        out_shape=out_shape,
        grid_spec=pltpu.PrefetchScalarGridSpec(
            num_scalar_prefetch=0,
            grid=grid,
            in_specs=in_specs,
            out_specs=out_specs,
        ),
        # Pure elementwise add of identical shape/dtype: write the result over
        # the token-embedding buffer (no second (S, B, E) HBM allocation).
        input_output_aliases={0: 0},
        compiler_params=pltpu.CompilerParams(
            dimension_semantics=("parallel",),
            vmem_limit_bytes=vmem_limit,
        ),
    )(*args)

    if use_2d:
        out = out.reshape(S, B, E)
    return out


# --------------------------------------------------------------------------
# Demo / self-check
# --------------------------------------------------------------------------
if __name__ == "__main__":
    maxlen = 750

    # --- small-dim (lane-dense flattened) path: f32, S=8, B=2, E=32 ----------
    E = 32
    pos_embedding = _build_pos_embedding(E, maxlen)
    S, B = 8, 2
    x = jax.random.normal(jax.random.PRNGKey(0), (S, B, E), dtype=jnp.float32)
    ref = x + pos_embedding[:S][:, None, :]
    out = jax.block_until_ready(positional_encoding(x, pos_embedding))
    assert out.shape == (S, B, E)
    assert jnp.allclose(out, ref, atol=1e-6), "f32 mismatch vs reference"

    # --- ragged S (S=9): exercises the masked partial last block, no padding -
    S2 = 9
    x2 = jax.random.normal(jax.random.PRNGKey(1), (S2, B, E), dtype=jnp.float32)
    ref2 = x2 + pos_embedding[:S2][:, None, :]
    out2 = jax.block_until_ready(positional_encoding(x2, pos_embedding))
    assert out2.shape == (S2, B, E)
    assert jnp.allclose(out2, ref2, atol=1e-6), "ragged-S mismatch vs reference"

    # --- 3D path with transformer-like dims (B>=8, E%128==0), bf16 -----------
    S3, B3, E3 = 16, 8, 128
    pos3 = _build_pos_embedding(E3, maxlen)
    x3 = jax.random.normal(jax.random.PRNGKey(2), (S3, B3, E3), dtype=jnp.bfloat16)
    ref3 = x3.astype(jnp.float32) + pos3[:S3][:, None, :]
    out3 = jax.block_until_ready(positional_encoding(x3, pos3))
    assert out3.dtype == jnp.bfloat16 and out3.shape == (S3, B3, E3)
    assert jnp.allclose(out3.astype(jnp.float32), ref3, atol=0.1), "bf16 mismatch vs reference"

    print("KERNEL_OK")
</pallas_src>

<mosaic_0001>
module attributes {stable_mosaic.version = 11 : i64} {
  func.func @_pe_kernel_2d(%arg0: i32, %arg1: memref<8x64xf32, #tpu.memory_space<vmem>>, %arg2: memref<8x32xf32, #tpu.memory_space<vmem>>, %arg3: memref<8x64xf32, #tpu.memory_space<vmem>>) attributes {dimension_semantics = [#tpu.dimension_semantics<parallel>], iteration_bounds = array<i64: 1>, scalar_prefetch = 0 : i64, scratch_operands = 0 : i64, tpu.core_type = #tpu.core_type<tc>, window_params = [{transform_indices = @transform_0, window_bounds = array<i64: 8, 64>}, {transform_indices = @transform_1, window_bounds = array<i64: 8, 32>}, {transform_indices = @transform_2, window_bounds = array<i64: 8, 64>}]} {
    %c0 = arith.constant 0 : index
    %c0_0 = arith.constant 0 : index
    %0 = vector.load %arg2[%c0, %c0_0] : memref<8x32xf32, #tpu.memory_space<vmem>>, vector<8x32xf32>
    %1 = tpu.concatenate %0, %0 in 1 : vector<8x32xf32>, vector<8x32xf32> -> vector<8x64xf32>
    %c0_1 = arith.constant 0 : index
    %c0_2 = arith.constant 0 : index
    %2 = vector.load %arg1[%c0_1, %c0_2] : memref<8x64xf32, #tpu.memory_space<vmem>>, vector<8x64xf32>
    %3 = arith.addf %2, %1 : vector<8x64xf32>
    %c0_3 = arith.constant 0 : index
    %c0_4 = arith.constant 0 : index
    %4 = vector.load %arg3[%c0_3, %c0_4] : memref<8x64xf32, #tpu.memory_space<vmem>>, vector<8x64xf32>
    tpu.vector_store %arg3[%c0_3, %c0_4], %3 {strides = array<i32>} : memref<8x64xf32, #tpu.memory_space<vmem>>, vector<8x64xf32>,
    return
  }
  func.func @transform_0(%arg0: i32) -> (i32, i32) {
    %c0_i32 = arith.constant 0 : i32
    %c0_i32_0 = arith.constant 0 : i32
    return %arg0, %c0_i32 : i32, i32
  }
  func.func @transform_1(%arg0: i32) -> (i32, i32) {
    %c0_i32 = arith.constant 0 : i32
    %c0_i32_0 = arith.constant 0 : i32
    return %arg0, %c0_i32 : i32, i32
  }
  func.func @transform_2(%arg0: i32) -> (i32, i32) {
    %c0_i32 = arith.constant 0 : i32
    %c0_i32_0 = arith.constant 0 : i32
    return %arg0, %c0_i32 : i32, i32
  }
}

</mosaic_0001>

<bundles_post_ra>
// kernel: tpu_custom_call.1
= control target key start
LH: loop header
LB: loop body
LE: loop exit
PB: predicated region body
PF: predicated region fallthrough
CT: control target
= control target key end

     0   :  { %7 = vsyncpa [#allocation3], 0  ;;  %s146_s0 = inlined_call_operand.hbm [shape: f32[8,64], index: 0, kind: input, shape index: {}, may-alias: {0,2}]   ;;  %s147_s1 = inlined_call_operand.vmem [shape: f32[8,32], index: 1, kind: input, shape index: {}]   ;;  %s148_s2 = inlined_call_operand.hbm [shape: f32[8,64], index: 2, kind: output, shape index: {}, may-alias: {0,2}]  }
   0x1   :  { %8 = vsyncpa [#allocation4], 0  ;;  %s101_s9 = smov [#allocation2]   ;;  %s53_s13 = scalar_lea.hbm %s146_s0, 128 }
   0x2   :  { %s15_s10 = sshll.u32 %s101_s9, 4  ;;  %p54_p0 = scmp.ne.s32.totalorder %s146_s0, %s53_s13  ;;  %s16_s10 = int_to_ptr.vmem [resolvable:$true] %s15_s10 }
   0x3   :  { %p57_p1 = scmp.lt.u32.totalorder %s53_s13, %s146_s0 }
   0x5   :  { %p59_p2 = pnand %p57_p1, %p54_p0 }
   0x7   :  { %62 = shalt.err (!%p59_p2)
}
   0x8   :  { %s63_s18 = scalar_lea.vmem %s16_s10, 128  ;;  %p68_p4 = scmp.lt.s32.totalorder %s16_s10, %s16_s10 }
   0x9   :  { %p64_p3 = scmp.ne.s32.totalorder %s16_s10, %s63_s18  ;;  %p69_p5 = scmp.lt.s32.totalorder %s63_s18, %s63_s18 }
   0xb   :  { %p70_p6 = por %p69_p5, %p68_p4 }
   0xd   :  { %p71_p7 = pnand %p70_p6, %p64_p3 }
   0xf   :  { %74 = shalt.err (!%p71_p7)
}
  0x10   :  { %18 = dma.hbm_to_vmem [thread:$0]  %s146_s0, 128, %s16_s10, [#allocation3]  }
  0x11   :  { %97 = dma.done.wait [#allocation3], 128  }
  0x12   :  { %98 = vsyncadd [#allocation3], 4294967168  ;;  %v24_v0 = vld [vmem:[%s147_s1] sm:$0xff]  ;;  %s102_s23 = smov 32   ;;  %vm29_vm0 = vcmask 261120   ;;  %s103_s24 = smov [#allocation5]  }
  0x13   :  { %26 = vrot.lane.b32.xlu0 %v24_v0, %s102_s23  ;;  %v31_v1 = vld [vmem:[#allocation2] sm:$0xff]  ;;  %s41_s25 = sshll.u32 %s103_s24, 4  ;;  %vm33_vm1 = vcmask 523264   ;;  %s42_s25 = int_to_ptr.vmem [resolvable:$true] %s41_s25 }
  0x14   :  { %s75_s26 = scalar_lea.vmem %s42_s25, 128  ;;  %p80_p9 = scmp.lt.s32.totalorder %s42_s25, %s42_s25 }
  0x15   :  { %p76_p8 = scmp.ne.s32.totalorder %s42_s25, %s75_s26  ;;  %p81_p10 = scmp.lt.s32.totalorder %s75_s26, %s75_s26 }
  0x17   :  { %p82_p11 = por %p81_p10, %p80_p9 }
  0x19   :  { %p83_p12 = pnand %p82_p11, %p76_p8 }
  0x85   :  { %v27_v2 = vpop.permute.xlu0 %26 }
  0x86   :  { %v30_v3 = vsel %vm29_vm0, %v24_v0, %v27_v2 }
  0x87   :  { %v32_v4 = vadd.f32 %v31_v1, %v30_v3 }
  0x89   :  { %34 = vst.msk [vmem:[#allocation5] sm:$0xff] %vm33_vm1, %v32_v4 }
  0x8a   :  { %86 = shalt.err (!%p83_p12)
}
  0x8b   :  { %s87_s27 = scalar_lea.hbm %s148_s2, 128 }
  0x8c   :  { %p88_p13 = scmp.ne.s32.totalorder %s148_s2, %s87_s27  ;;  %p91_p0 = scmp.lt.u32.totalorder %s87_s27, %s148_s2 }
  0x8e   :  { %p93_p1 = pnand %p91_p0, %p88_p13 }
  0x90   :  { %96 = shalt.err (!%p93_p1)
}
  0x91   :  { %44 = dma.vmem_to_hbm [thread:$0]  %s42_s25, 128, %s148_s2, [#allocation4]  }
  0x92   :  { %99 = dma.done.wait [#allocation4], 128  }
  0x93   :  { %100 = vsyncadd [#allocation4], 4294967168 }
  0x94   :  { %48 = vsyncpa [#allocation3], 1 }
  0x95   :  { %49 = vsyncpa [#allocation4], 1 }

</bundles_post_ra>
